<compile_context>
chip_gen: v5e
topology: v5e:2x2
jax: 0.10.0
libtpu: 0.0.40
codegen_flags: <defaults>
</compile_context>

<pallas_src>
import math
import jax
import jax.numpy as jnp
from jax import lax
from jax.experimental import pallas as pl
from jax.experimental.pallas import tpu as pltpu


def _make_msa_kernel(batch_block, seq_len, d_model, n_heads, compute_dtype, approx_recip):
    d_head = d_model // n_heads
    scale = 1.0 / math.sqrt(d_head)
    nt_dims = (((1,), (1,)), ((), ()))  # contract last dims of both: A @ B^T (no explicit transpose)
    nn_dims = (((1,), (0,)), ((), ()))  # plain A @ B

    def kernel(x_ref, wqkv_ref, bqkv_ref, wo_ref, bo_ref, o_ref):
        x = x_ref[...]                       # (batch_block*S, D)
        wqkv = wqkv_ref[...]                 # (D, 3D)   (possibly bf16)
        wo = wo_ref[...]                     # (D, D)    (possibly bf16)
        bqkv = bqkv_ref[...]                 # (1, 3D)   f32
        bo = bo_ref[...]                     # (1, D)    f32

        # ---- fused Q/K/V projection: one wide MXU matmul, f32 accumulation ----
        qkv = jnp.dot(x.astype(compute_dtype), wqkv,
                      preferred_element_type=jnp.float32) + bqkv      # (Bb*S, 3D) f32

        q = qkv[:, 0 * d_model:1 * d_model] * scale   # fold 1/sqrt(d_head) into Q once
        k = qkv[:, 1 * d_model:2 * d_model]
        v = qkv[:, 2 * d_model:3 * d_model]

        qc = q.astype(compute_dtype)
        kc = k.astype(compute_dtype)
        vc = v.astype(compute_dtype)

        # Static unrolled loops over (batch rows in this block) x (heads); all
        # matmuls are plain 2-D MXU dots with sublane-aligned row slices.
        for b in range(batch_block):
            r0 = b * seq_len
            y = jnp.zeros((seq_len, d_model), jnp.float32)
            for h in range(n_heads):
                c0 = h * d_head
                qh = qc[r0:r0 + seq_len, c0:c0 + d_head]     # (S, dh)
                kh = kc[r0:r0 + seq_len, c0:c0 + d_head]
                vh = vc[r0:r0 + seq_len, c0:c0 + d_head]

                # scores = qh @ kh^T on the MXU via NT dimension numbers.
                s = lax.dot_general(qh, kh, nt_dims,
                                    preferred_element_type=jnp.float32)   # (S, S) f32

                # Numerically-stable softmax; elementwise math kept in f32.
                m = jnp.max(s, axis=-1, keepdims=True)
                e = jnp.exp(s - m)
                p = e * pl.reciprocal(jnp.sum(e, axis=-1, keepdims=True),
                                      approx=approx_recip)

                ctx = lax.dot_general(p.astype(compute_dtype), vh, nn_dims,
                                      preferred_element_type=jnp.float32)  # (S, dh)

                # Distribute the output projection over heads: no lane-concat.
                y = y + lax.dot_general(ctx.astype(compute_dtype),
                                        wo[c0:c0 + d_head, :], nn_dims,
                                        preferred_element_type=jnp.float32)

            o_ref[pl.ds(r0, seq_len), :] = (y + bo).astype(o_ref.dtype)

    return kernel


def msa_pallas(x, params, n_heads, *, compute_dtype=jnp.float32,
               approx_recip=False, batch_block=None):
    """x: (B, S, D) float32. params: dict of wq, bq, wk, bk, wv, bv, wo, bo.

    compute_dtype: dtype fed to the MXU (use jnp.bfloat16 on v6e/v7x for ~2x
        MXU throughput; accumulation and softmax stay f32).
    approx_recip: use the EUP approximate reciprocal for the softmax denom.
    """
    B, S, D = x.shape
    if D % n_heads != 0:
        raise ValueError(f"Embedding dimension {D} must be divisible by {n_heads}.")

    if batch_block is None:
        # Keep >=2 parallel grid steps when possible (v7x has 2 TensorCores);
        # on v5e/v6e the extra ~0.35us/step is negligible at these sizes.
        batch_block = B // 2 if (B % 2 == 0 and B >= 2) else 1
    assert B % batch_block == 0, "batch_block must divide the batch size"
    grid = (B // batch_block,)
    row_block = batch_block * S

    # Fuse Q/K/V weights & biases in the wrapper (host-side, free).
    wqkv = jnp.concatenate([params["wq"], params["wk"], params["wv"]], axis=1)   # (D, 3D)
    bqkv = jnp.concatenate([params["bq"], params["bk"], params["bv"]], axis=1)   # (1, 3D)
    wo, bo = params["wo"], params["bo"]
    wqkv = wqkv.astype(compute_dtype)
    wo_c = wo.astype(compute_dtype)

    # Present sequences as a (B*S, D) row slab (XLA-level reshape, free):
    # blocks are sublane-aligned (row_block is a multiple of 8 since S=8k here).
    x2 = x.reshape(B * S, D)

    kernel = _make_msa_kernel(batch_block, S, D, n_heads, compute_dtype, approx_recip)

    out2 = pl.pallas_call(
        kernel,
        out_shape=jax.ShapeDtypeStruct((B * S, D), x.dtype),
        grid_spec=pltpu.PrefetchScalarGridSpec(
            num_scalar_prefetch=0,
            grid=grid,
            in_specs=[
                pl.BlockSpec((row_block, D), lambda i: (i, 0)),   # x rows for this step
                pl.BlockSpec((D, 3 * D), lambda i: (0, 0)),       # fused qkv weight (resident)
                pl.BlockSpec((1, 3 * D), lambda i: (0, 0)),       # fused qkv bias
                pl.BlockSpec((D, D), lambda i: (0, 0)),           # out_proj weight
                pl.BlockSpec((1, D), lambda i: (0, 0)),           # out_proj bias
            ],
            out_specs=pl.BlockSpec((row_block, D), lambda i: (i, 0)),
        ),
        compiler_params=pltpu.CompilerParams(
            dimension_semantics=("parallel",),
            vmem_limit_bytes=32 * 1024 * 1024,  # headroom for large-D ViT configs; fits v7x's 64 MiB
        ),
    )(x2, wqkv, bqkv, wo_c, bo)

    return out2.reshape(B, S, D)


def msa_reference(x, params, n_heads):
    """Pure-JAX reference mirroring the PyTorch forward exactly."""
    B, S, D = x.shape
    dh = D // n_heads

    def proj(w, b):
        return x @ w + b  # (B, S, D)

    q = proj(params["wq"], params["bq"]).reshape(B, S, n_heads, dh).transpose(0, 2, 1, 3)
    k = proj(params["wk"], params["bk"]).reshape(B, S, n_heads, dh).transpose(0, 2, 1, 3)
    v = proj(params["wv"], params["bv"]).reshape(B, S, n_heads, dh).transpose(0, 2, 1, 3)

    scores = jnp.einsum("bhqd,bhkd->bhqk", q, k) / math.sqrt(dh)
    attn = jax.nn.softmax(scores, axis=-1)
    out = jnp.einsum("bhqk,bhkd->bhqd", attn, v).transpose(0, 2, 1, 3).reshape(B, S, D)
    return out @ params["wo"] + params["bo"]


def init_params(key, d):
    """Xavier-uniform weights (as in _init_weights), zero biases. Stored (D_in, D_out)."""
    limit = math.sqrt(6.0 / (d + d))
    keys = jax.random.split(key, 4)
    p = {}
    for name, k in zip(["wq", "wk", "wv", "wo"], keys):
        p[name] = jax.random.uniform(k, (d, d), jnp.float32, -limit, limit)
    for name in ["bq", "bk", "bv", "bo"]:
        p[name] = jnp.zeros((1, d), jnp.float32)
    return p


if __name__ == "__main__":
    B, S, D, n_heads = 2, 8, 32, 2

    key = jax.random.PRNGKey(0)
    k_x, k_p = jax.random.split(key)
    x = jax.random.normal(k_x, (B, S, D), jnp.float32)
    params = init_params(k_p, D)

    ref = msa_reference(x, params, n_heads)

    # Exact path: f32 MXU operands, exact reciprocal -> tight tolerance.
    out = jax.block_until_ready(
        msa_pallas(x, params, n_heads, compute_dtype=jnp.float32, approx_recip=False))
    assert out.shape == (B, S, D)
    assert jnp.allclose(out, ref, atol=2e-5, rtol=2e-5), "Pallas MSA (f32) mismatch vs reference"

    # Fast path (v6e/v7x-oriented): bf16 MXU operands + EUP approx reciprocal,
    # f32 accumulation and f32 softmax -> looser tolerance.
    out_fast = jax.block_until_ready(
        msa_pallas(x, params, n_heads, compute_dtype=jnp.bfloat16, approx_recip=True))
    assert jnp.allclose(out_fast, ref, atol=1e-1, rtol=1e-1), "Pallas MSA (bf16) mismatch vs reference"

    # TODO(synk): the module also caches self.attention_weights as a side effect;
    # only the forward output is produced here.
    print("KERNEL_OK")
</pallas_src>

<mosaic_0001>
module attributes {stable_mosaic.version = 11 : i64} {
  func.func @kernel(%arg0: i32, %arg1: memref<8x32xf32, #tpu.memory_space<vmem>>, %arg2: memref<32x96xf32, #tpu.memory_space<vmem>>, %arg3: memref<1x96xf32, #tpu.memory_space<vmem>>, %arg4: memref<32x32xf32, #tpu.memory_space<vmem>>, %arg5: memref<1x32xf32, #tpu.memory_space<vmem>>, %arg6: memref<8x32xf32, #tpu.memory_space<vmem>>) attributes {dimension_semantics = [#tpu.dimension_semantics<parallel>], iteration_bounds = array<i64: 2>, scalar_prefetch = 0 : i64, scratch_operands = 0 : i64, tpu.core_type = #tpu.core_type<tc>, window_params = [{transform_indices = @transform_0, window_bounds = array<i64: 8, 32>}, {pipeline_mode = #tpu.pipeline_mode<synchronous>, transform_indices = @transform_1, window_bounds = array<i64: 32, 96>}, {pipeline_mode = #tpu.pipeline_mode<synchronous>, transform_indices = @transform_2, window_bounds = array<i64: 1, 96>}, {pipeline_mode = #tpu.pipeline_mode<synchronous>, transform_indices = @transform_3, window_bounds = array<i64: 32, 32>}, {pipeline_mode = #tpu.pipeline_mode<synchronous>, transform_indices = @transform_4, window_bounds = array<i64: 1, 32>}, {transform_indices = @transform_5, window_bounds = array<i64: 8, 32>}]} {
    %c0 = arith.constant 0 : index
    %c0_0 = arith.constant 0 : index
    %0 = vector.load %arg1[%c0, %c0_0] : memref<8x32xf32, #tpu.memory_space<vmem>>, vector<8x32xf32>
    %c0_1 = arith.constant 0 : index
    %c0_2 = arith.constant 0 : index
    %1 = vector.load %arg2[%c0_1, %c0_2] : memref<32x96xf32, #tpu.memory_space<vmem>>, vector<32x96xf32>
    %c0_3 = arith.constant 0 : index
    %c0_4 = arith.constant 0 : index
    %2 = vector.load %arg4[%c0_3, %c0_4] : memref<32x32xf32, #tpu.memory_space<vmem>>, vector<32x32xf32>
    %c0_5 = arith.constant 0 : index
    %c0_6 = arith.constant 0 : index
    %3 = vector.load %arg3[%c0_5, %c0_6] : memref<1x96xf32, #tpu.memory_space<vmem>>, vector<1x96xf32>
    %c0_7 = arith.constant 0 : index
    %c0_8 = arith.constant 0 : index
    %4 = vector.load %arg5[%c0_7, %c0_8] : memref<1x32xf32, #tpu.memory_space<vmem>>, vector<1x32xf32>
    %cst = arith.constant dense<0.000000e+00> : vector<8x96xf32>
    %5 = tpu.matmul %0, %1, %cst {dimension_numbers = #tpu.dot_dimension_numbers<[1], [0], [0], [1], [0, 0, 1, 1], [], []>} : vector<8x32xf32>, vector<32x96xf32>, vector<8x96xf32> -> vector<8x96xf32>
    %6 = vector.broadcast %3 : vector<1x96xf32> to vector<8x96xf32>
    %7 = arith.addf %5, %6 : vector<8x96xf32>
    %8 = vector.extract_strided_slice %7 {offsets = [0, 0], sizes = [8, 32], strides = [1, 1]} : vector<8x96xf32> to vector<8x32xf32>
    %cst_9 = arith.constant 2.500000e-01 : f32
    %9 = vector.broadcast %cst_9 : f32 to vector<8x32xf32>
    %10 = arith.mulf %8, %9 : vector<8x32xf32>
    %11 = vector.extract_strided_slice %7 {offsets = [0, 32], sizes = [8, 32], strides = [1, 1]} : vector<8x96xf32> to vector<8x32xf32>
    %12 = vector.extract_strided_slice %7 {offsets = [0, 64], sizes = [8, 32], strides = [1, 1]} : vector<8x96xf32> to vector<8x32xf32>
    %cst_10 = arith.constant 0.000000e+00 : f32
    %13 = vector.broadcast %cst_10 : f32 to vector<8x32xf32>
    %14 = vector.extract_strided_slice %10 {offsets = [0, 0], sizes = [8, 16], strides = [1, 1]} : vector<8x32xf32> to vector<8x16xf32>
    %15 = vector.extract_strided_slice %11 {offsets = [0, 0], sizes = [8, 16], strides = [1, 1]} : vector<8x32xf32> to vector<8x16xf32>
    %16 = vector.extract_strided_slice %12 {offsets = [0, 0], sizes = [8, 16], strides = [1, 1]} : vector<8x32xf32> to vector<8x16xf32>
    %cst_11 = arith.constant dense<0.000000e+00> : vector<8x8xf32>
    %17 = tpu.matmul %14, %15, %cst_11 {dimension_numbers = #tpu.dot_dimension_numbers<[1], [1], [0], [0], [0, 0, 1, 0], [], []>} : vector<8x16xf32>, vector<8x16xf32>, vector<8x8xf32> -> vector<8x8xf32>
    %cst_12 = arith.constant dense<0xFF800000> : vector<8xf32>
    %18 = vector.multi_reduction <maximumf>, %17, %cst_12 [1] : vector<8x8xf32> to vector<8xf32>
    %19 = vector.shape_cast %18 : vector<8xf32> to vector<8x1xf32>
    %20 = vector.broadcast %19 : vector<8x1xf32> to vector<8x8xf32>
    %21 = arith.subf %17, %20 : vector<8x8xf32>
    %22 = math.exp %21 : vector<8x8xf32>
    %cst_13 = arith.constant dense<0.000000e+00> : vector<8xf32>
    %23 = vector.multi_reduction <add>, %22, %cst_13 [1] : vector<8x8xf32> to vector<8xf32>
    %24 = vector.shape_cast %23 : vector<8xf32> to vector<8x1xf32>
    %25 = tpu.reciprocal %24 : vector<8x1xf32> -> vector<8x1xf32>
    %26 = vector.broadcast %25 : vector<8x1xf32> to vector<8x8xf32>
    %27 = arith.mulf %22, %26 : vector<8x8xf32>
    %cst_14 = arith.constant dense<0.000000e+00> : vector<8x16xf32>
    %28 = tpu.matmul %27, %16, %cst_14 {dimension_numbers = #tpu.dot_dimension_numbers<[1], [0], [0], [1], [0, 0, 1, 1], [], []>} : vector<8x8xf32>, vector<8x16xf32>, vector<8x16xf32> -> vector<8x16xf32>
    %29 = vector.extract_strided_slice %2 {offsets = [0, 0], sizes = [16, 32], strides = [1, 1]} : vector<32x32xf32> to vector<16x32xf32>
    %cst_15 = arith.constant dense<0.000000e+00> : vector<8x32xf32>
    %30 = tpu.matmul %28, %29, %cst_15 {dimension_numbers = #tpu.dot_dimension_numbers<[1], [0], [0], [1], [0, 0, 1, 1], [], []>} : vector<8x16xf32>, vector<16x32xf32>, vector<8x32xf32> -> vector<8x32xf32>
    %31 = arith.addf %13, %30 : vector<8x32xf32>
    %32 = vector.extract_strided_slice %10 {offsets = [0, 16], sizes = [8, 16], strides = [1, 1]} : vector<8x32xf32> to vector<8x16xf32>
    %33 = vector.extract_strided_slice %11 {offsets = [0, 16], sizes = [8, 16], strides = [1, 1]} : vector<8x32xf32> to vector<8x16xf32>
    %34 = vector.extract_strided_slice %12 {offsets = [0, 16], sizes = [8, 16], strides = [1, 1]} : vector<8x32xf32> to vector<8x16xf32>
    %cst_16 = arith.constant dense<0.000000e+00> : vector<8x8xf32>
    %35 = tpu.matmul %32, %33, %cst_16 {dimension_numbers = #tpu.dot_dimension_numbers<[1], [1], [0], [0], [0, 0, 1, 0], [], []>} : vector<8x16xf32>, vector<8x16xf32>, vector<8x8xf32> -> vector<8x8xf32>
    %cst_17 = arith.constant dense<0xFF800000> : vector<8xf32>
    %36 = vector.multi_reduction <maximumf>, %35, %cst_17 [1] : vector<8x8xf32> to vector<8xf32>
    %37 = vector.shape_cast %36 : vector<8xf32> to vector<8x1xf32>
    %38 = vector.broadcast %37 : vector<8x1xf32> to vector<8x8xf32>
    %39 = arith.subf %35, %38 : vector<8x8xf32>
    %40 = math.exp %39 : vector<8x8xf32>
    %cst_18 = arith.constant dense<0.000000e+00> : vector<8xf32>
    %41 = vector.multi_reduction <add>, %40, %cst_18 [1] : vector<8x8xf32> to vector<8xf32>
    %42 = vector.shape_cast %41 : vector<8xf32> to vector<8x1xf32>
    %43 = tpu.reciprocal %42 : vector<8x1xf32> -> vector<8x1xf32>
    %44 = vector.broadcast %43 : vector<8x1xf32> to vector<8x8xf32>
    %45 = arith.mulf %40, %44 : vector<8x8xf32>
    %cst_19 = arith.constant dense<0.000000e+00> : vector<8x16xf32>
    %46 = tpu.matmul %45, %34, %cst_19 {dimension_numbers = #tpu.dot_dimension_numbers<[1], [0], [0], [1], [0, 0, 1, 1], [], []>} : vector<8x8xf32>, vector<8x16xf32>, vector<8x16xf32> -> vector<8x16xf32>
    %47 = vector.extract_strided_slice %2 {offsets = [16, 0], sizes = [16, 32], strides = [1, 1]} : vector<32x32xf32> to vector<16x32xf32>
    %cst_20 = arith.constant dense<0.000000e+00> : vector<8x32xf32>
    %48 = tpu.matmul %46, %47, %cst_20 {dimension_numbers = #tpu.dot_dimension_numbers<[1], [0], [0], [1], [0, 0, 1, 1], [], []>} : vector<8x16xf32>, vector<16x32xf32>, vector<8x32xf32> -> vector<8x32xf32>
    %49 = arith.addf %31, %48 : vector<8x32xf32>
    %50 = vector.broadcast %4 : vector<1x32xf32> to vector<8x32xf32>
    %51 = arith.addf %49, %50 : vector<8x32xf32>
    %c0_21 = arith.constant 0 : index
    %c0_22 = arith.constant 0 : index
    %52 = vector.load %arg6[%c0_21, %c0_22] : memref<8x32xf32, #tpu.memory_space<vmem>>, vector<8x32xf32>
    tpu.vector_store %arg6[%c0_21, %c0_22], %51 {strides = array<i32>} : memref<8x32xf32, #tpu.memory_space<vmem>>, vector<8x32xf32>,
    return
  }
  func.func @transform_0(%arg0: i32) -> (i32, i32) {
    %c0_i32 = arith.constant 0 : i32
    %c0_i32_0 = arith.constant 0 : i32
    return %arg0, %c0_i32 : i32, i32
  }
  func.func @transform_1(%arg0: i32) -> (i32, i32) {
    %c0_i32 = arith.constant 0 : i32
    %c0_i32_0 = arith.constant 0 : i32
    %c0_i32_1 = arith.constant 0 : i32
    return %c0_i32, %c0_i32_0 : i32, i32
  }
  func.func @transform_2(%arg0: i32) -> (i32, i32) {
    %c0_i32 = arith.constant 0 : i32
    %c0_i32_0 = arith.constant 0 : i32
    %c0_i32_1 = arith.constant 0 : i32
    return %c0_i32, %c0_i32_0 : i32, i32
  }
  func.func @transform_3(%arg0: i32) -> (i32, i32) {
    %c0_i32 = arith.constant 0 : i32
    %c0_i32_0 = arith.constant 0 : i32
    %c0_i32_1 = arith.constant 0 : i32
    return %c0_i32, %c0_i32_0 : i32, i32
  }
  func.func @transform_4(%arg0: i32) -> (i32, i32) {
    %c0_i32 = arith.constant 0 : i32
    %c0_i32_0 = arith.constant 0 : i32
    %c0_i32_1 = arith.constant 0 : i32
    return %c0_i32, %c0_i32_0 : i32, i32
  }
  func.func @transform_5(%arg0: i32) -> (i32, i32) {
    %c0_i32 = arith.constant 0 : i32
    %c0_i32_0 = arith.constant 0 : i32
    return %arg0, %c0_i32 : i32, i32
  }
}

</mosaic_0001>

<bundles_post_ra>
// kernel: tpu_custom_call.1
= control target key start
LH: loop header
LB: loop body
LE: loop exit
PB: predicated region body
PF: predicated region fallthrough
CT: control target
= control target key end

     0   :  { %10 = vsyncpa [#allocation3], 0  ;;  %s1107_s0 = inlined_call_operand.hbm [shape: f32[16,32], index: 0, kind: input, shape index: {}]   ;;  %s1108_s1 = inlined_call_operand.hbm [shape: f32[32,96], index: 1, kind: input, shape index: {}]   ;;  %s1109_s2 = inlined_call_operand.vmem [shape: f32[1,96], index: 2, kind: input, shape index: {}]   ;;  %s1110_s3 = inlined_call_operand.hbm [shape: f32[32,32], index: 3, kind: input, shape index: {}]   ;;  %s1111_s4 = inlined_call_operand.vmem [shape: f32[1,32], index: 4, kind: input, shape index: {}]   ;;  %s1112_s5 = inlined_call_operand.hbm [shape: f32[16,32], index: 5, kind: output, shape index: {}]  }
   0x1   :  { %12 = vsyncpa [#allocation3 + $0x1], 0 }
   0x2   :  { %13 = vsyncpa [#allocation6], 0 }
   0x3   :  { %14 = vsyncpa [#allocation4], 0 }
   0x4   :  { %16 = vsyncpa [#allocation4 + $0x1], 0  ;;  %s938_s18 = smov 0   ;;  %s940_s19 = smov 0  }
   0x5   :  { %s942_s20 = smov 0   ;;  %s944_s21 = smov 0  }
   0x6 LB: > { %s174_s24 = sshll.u32 %s1108_s1, 4  ;;  %s962_s25 = sadd.s32 4294967295, %s897_s21   ;;  %s897_s21 = sphi %s944_s21, %s1123_s21   ;;  %s893_s20 = sphi %s942_s20, %s1122_s20   ;;  %s889_s19 = sphi %s940_s19, %s1121_s19   ;;  %s885_s18 = sphi %s938_s18, %s1120_s18   ;;  %s175_s24 = int_to_ptr.hbm [resolvable:$true] %s174_s24 }
   0x7   : > { %p629_p0 = scmp.ge.s32.totalorder %s897_s21, 1  ;;  %p43_p1 = scmp.eq.s32.totalorder %s962_s25, 0 }
   0x8   : > { %p163_p2 = scmp.lt.s32.totalorder %s897_s21, 3  ;;  %s899_s27 = smov [#allocation5]  }
   0x9   : > { %s176_s28 = sshll.u32 %s899_s27, 4  ;;  %s191_s6 = sshll.u32 %s1110_s3, 4  ;;  %s177_s28 = int_to_ptr.vmem [resolvable:$true] %s176_s28  ;;  %s192_s6 = int_to_ptr.hbm [resolvable:$true] %s191_s6 }
   0xa   : > { %p967_p3 = pnand %p629_p0, %p163_p2  ;;  %s900_s7 = smov [#allocation7]  }
   0xb   : > { %s193_s8 = sshll.u32 %s900_s7, 4  ;;  %s901_s9 = smov 128   ;;  %s194_s8 = int_to_ptr.vmem [resolvable:$true] %s193_s8 }
   0xc   : > { %p665_p4 = pneg %p967_p3  ;;  %s902_s10 = smov 8  }
   0xd   : > { %s628_s11 = sadd.s32 4294967294, %s897_s21   ;;  %s981_s12 = sadd.s32 1, %s897_s21  }
   0xe   : > { %p666_p6 = pnand %p665_p4, %p43_p1  ;;  %s26_s13 = ssub.s32 %s897_s21, %s981_s12 }
   0xf   : > { %s29_s14 = sadd.s32 1, %s893_s20  ;;  %p27_p7 = scmp.eq.s32.totalorder %s26_s13, 0 }
  0x10   : > { %668 = dma.hbm_to_vmem [thread:$0]  (!%p666_p6), %s175_s24, 512, %s177_s28, [#allocation6], %s901_s9, %s901_s9, %s902_s10  }
  0x11   : > { %671 = dma.hbm_to_vmem [thread:$0]  (!%p666_p6), %s192_s6, 512, %s194_s8, [#allocation6], %s901_s9, %s901_s9, %s902_s10  }
  0x12   : > { %p36_p8 = scmp.ne.s32.totalorder %s893_s20, %s889_s19  ;;  %p37_p9 = scmp.eq.s32.totalorder %s897_s21, 0 }
  0x13   : > { %p42_p10 = scmp.ne.s32.totalorder %s889_s19, %s885_s18  ;;  %p150_p13 = scmp.eq.s32.totalorder %s962_s25, 1 }
  0x14   : > { %s992_s15 = scalar_select %p27_p7, %s893_s20, %s29_s14  }
  0x15   : > { %p994_p11 = por %p37_p9, %p36_p8  ;;  %p1000_p12 = por %p43_p1, %p42_p10 }
  0x16   : > { %p156_p0 = scmp.eq.s32.totalorder %s628_s11, 1  ;;  %p682_p2 = scmp.lt.s32.totalorder %s897_s21, 2 }
  0x17   : > { %s210_s22 = sand.u32 1, %s893_s20   ;;  %p1007_p4 = por %p150_p13, %p36_p8 }
  0x18   : > { %p1011_p6 = por %p156_p0, %p42_p10  ;;  %s633_s27 = sshll.u32 %s210_s22, 3 }
  0x19   : > { %s634_s28 = sshll.u32 %s897_s21, 3  ;;  %s214_s7 = scalar_lea.vmem [#allocation2], %s633_s27 }
  0x1a   : > { %s218_s6 = scalar_lea.hbm %s1107_s0, %s634_s28  ;;  %s222_s8 = sshll.u32 %s214_s7, 4  ;;  %s223_s8 = int_to_ptr.vmem [resolvable:$true] %s222_s8 }
  0x1b   : > { %s220_s9 = sshll.u32 %s218_s6, 4  ;;  %p1021_p7 = pnand %p682_p2, %p994_p11  ;;  %s221_s9 = int_to_ptr.hbm [resolvable:$true] %s220_s9 }
  0x1c   : > { %s211_s11 = scalar_lea.sflag [#allocation3], %s210_s22  ;;  %s797_s13 = sshra.s32 %s221_s9, 4  ;;  %s798_s13 = int_to_ptr.hbm [resolvable:$true] %s797_s13 }
  0x1d   : > { %s799_s14 = scalar_lea.hbm %s798_s13, 8  ;;  %p801_p9 = pneg %p1021_p7 }
  0x1e   : > { %p800_p8 = scmp.ne.s32.totalorder %s798_s13, %s799_s14  ;;  %s804_s29 = scalar_lea.hbm %s1107_s0, 16 }
  0x1f   : > { %p805_p11 = scmp.lt.s32.totalorder %s798_s13, %s1107_s0  ;;  %p806_p0 = scmp.lt.s32.totalorder %s804_s29, %s799_s14 }
  0x20   : > { %p802_p10 = pnand %p801_p9, %p800_p8 }
  0x21   : > { %p807_p2 = por %p806_p0, %p805_p11 }
  0x22   : > { %p803_p13 = pneg %p802_p10 }
  0x24   : > { %p808_p5 = pnand %p807_p2, %p803_p13 }
  0x26   : > { %811 = shalt.err (!%p808_p5)
}
  0x27   : > { %675 = dma.hbm_to_vmem [thread:$0]  (!%p1021_p7), %s221_s9, 128, %s223_s8, %s211_s11  }
  0x28   : > { %231 = sbr.rel (%p967_p3) target bundleno = 971 (0x3cb), region = 40  ;;  %s1038_s22 = sand.u32 (!%p967_p3), 1, %s889_s19  }
  0x29   : > { %s636_s6 = sshll.u32 (!%p967_p3), %s1038_s22, 3  ;;  %s234_s7 = scalar_lea.sflag (!%p967_p3), [#allocation3], %s1038_s22 }
  0x2a   : > { %s237_s13 = scalar_lea.vmem (!%p967_p3), [#allocation2], %s636_s6 }
  0x2d   : > { %872 = dma.done.wait (%p1000_p12), %s234_s7, 128  }
  0x2e   : > { %874 = vsyncadd (%p1000_p12), %s234_s7, 4294967168 }
  0x2f   : > { %876 = dma.done.wait (%p43_p1), [#allocation6], 1024  }
  0x30   : > { %878 = vsyncadd (%p43_p1), [#allocation6], 4294966272  ;;  %v279_v0 = vld [vmem:[#allocation5 + $0x18] sm:$0xff]  ;;  %v278_v1 = vld [vmem:[#allocation5 + $0x10] sm:$0xff]  ;;  %vm289_vm0 = vcmask 261120   ;;  %s903_s8 = smov 96  }
  0x31   : > { %305 = vmatpush.msra.mxu0 %v279_v0  ;;  %v277_v2 = vld [vmem:[#allocation5 + $0x8] sm:$0xff]  ;;  %v276_v3 = vld [vmem:[#allocation5] sm:$0xff]  ;;  %v275_v4 = vld [vmem:[%s237_s13] sm:$0xff]  ;;  %s904_s9 = smov 112   ;;  %s905_s10 = smov 80   ;;  %vm317_vm1 = vcmask 130048  }
  0x32   : > { %v727_v5 = vld [vmem:[%s1109_s2] ss:$0 sm:$0xff]  ;;  %vm343_vm2 = vcmask 64512   ;;  %s906_s11 = smov 64   ;;  %s907_s14 = smov 48   ;;  %v281_v27 = vld [vmem:[#allocation7 + $0x8] sm:$0xff] }
  0x33   : > { %306 = vmatpush.msra.mxu0 %v278_v1  ;;  %v280_v53 = vld [vmem:[#allocation7] sm:$0xff]  ;;  %v283_v54 = vld [vmem:[#allocation7 + $0x18] sm:$0xff]  ;;  %v282_v55 = vld [vmem:[#allocation7 + $0x10] sm:$0xff]  ;;  %s650_s27 = sshll.u32 %s962_s25, 3  ;;  %s274_s13 = scalar_lea.vmem [#allocation8], %s636_s6 }
  0x34   : > { %s534_s30 = scalar_lea.hbm %s1112_s5, %s650_s27  ;;  %v728_v58 = vld [vmem:[%s1111_s4] ss:$0 sm:$0xff]  ;;  %s536_s26 = sshll.u32 %s274_s13, 4  ;;  %s537_s26 = int_to_ptr.vmem [resolvable:$true] %s536_s26 }
  0x35   : > { %307 = vmatpush.msra.mxu0 %v277_v2  ;;  %s538_s17 = sshll.u32 %s534_s30, 4  ;;  %s524_s25 = scalar_lea.sflag [#allocation4], %s1038_s22  ;;  %s539_s17 = int_to_ptr.hbm [resolvable:$true] %s538_s17 }
  0x36   : > { %s847_s6 = scalar_lea.hbm %s1112_s5, 16 }
  0x37   : > { %308 = vmatpush.msra.mxu0 %v276_v3 }
  0x38   : > { %640 = vmatmul.msk.f32.vlgmr.msra.gmra.mxu0 %vm289_vm0, %v275_v4 }
  0xb5   : > { %v310_v6 = vpop.f32.mrf.mxu0 }
  0xb6   : > { %v311_v7 = vadd.f32 %v727_v5, %v310_v6 }
  0xb8   : > { %315 = vrot.lane.b32.xlu0 %v311_v7, %s903_s8  ;;  %v313_v8 = vmul.f32 0.25, %v311_v7  ;;  %s841_s8 = sshra.s32 %s539_s17, 4  ;;  %s842_s8 = int_to_ptr.hbm [resolvable:$true] %s841_s8 }
  0xb9   : > { %p848_p12 = scmp.lt.s32.totalorder %s842_s8, %s1112_s5 }
  0xba   : > { %394 = vrot.lane.b32.xlu1 %v313_v8, %s904_s9  ;;  %s843_s9 = scalar_lea.hbm %s842_s8, 8 }
  0xbb   : > { %p844_p1 = scmp.ne.s32.totalorder %s842_s8, %s843_s9  ;;  %p849_p7 = scmp.lt.s32.totalorder %s847_s6, %s843_s9 }
  0xbd   : > { %p845_p3 = pnand %p844_p1, %p1007_p4  ;;  %p850_p8 = por %p849_p7, %p848_p12 }
  0xbf   : > { %p846_p5 = pneg %p845_p3 }
  0xc0   : > { %396 = vrot.lane.b32.xlu0 %v311_v7, %s905_s10 }
  0xc1   : > { %p851_p9 = pnand %p850_p8, %p846_p5 }
 0x12a   : > { %v316_v9 = vpop.permute.xlu0 %315 }
 0x12b   : > { %641 = vmatpush.xpose.msk.msra.mxu1 %vm317_vm1, %v316_v9 }
 0x12c   : > { %v395_v11 = vpop.permute.xlu1 %394 }
 0x12e   : > { %642 = vmatmul.msk.f32.vlgmr.msra.gmra.mxu1 %vm317_vm1, %v313_v8 }
 0x12f   : > { %489 = vmatpush.msrb.mxu1 %v283_v54 }
 0x131   : > { %490 = vmatpush.msrb.mxu1 %v282_v55 }
 0x132   : > { %v397_v10 = vpop.permute.xlu0 %396 }
 0x133   : > { %644 = vmatpush.xpose.msk.msra.mxu3 %vm317_vm1, %v397_v10 }
 0x136   : > { %645 = vmatmul.msk.f32.vlgmr.msra.gmra.mxu3 %vm317_vm1, %v395_v11 }
 0x137   : > { %512 = vmatpush.msrb.mxu3 %v281_v27 }
 0x139   : > { %513 = vmatpush.msrb.mxu3 %v280_v53 }
 0x1ab   : > { %v340_v12 = vpop.f32.mrf.mxu1 }
 0x1ac   : > { %v344_v13 = vsel %vm343_vm2, %v340_v12, -inf }
 0x1ad   : > { %345 = vmax.xlane.f32.xlu1 %v344_v13 }
 0x1b9   : > { %v419_v14 = vpop.f32.mrf.mxu3 }
 0x1ba   : > { %v422_v15 = vsel %vm343_vm2, %v419_v14, -inf }
 0x1bb   : > { %423 = vmax.xlane.f32.xlu2 %v422_v15 }
 0x220   : > { %v346_v16 = vpop.xlane.xlu1 %345 }
 0x221   : > { %v347_v17 = vsub.f32 %v340_v12, %v346_v16 }
 0x223   : > { %v348_v18 = vmul.f32 1.442695, %v347_v17 }
 0x225   : > { %729 = vpow2.f32 %v348_v18 }
 0x22b   : > { %v730_v19 = vpop.eup %729 }
 0x22c   : > { %v350_v20 = vsel %vm343_vm2, %v730_v19, 0.0 }
 0x22d   : > { %351 = vadd.xlane.f32.xlu2 %v350_v20 }
 0x22e   : > { %v424_v21 = vpop.xlane.xlu2 %423 }
 0x22f   : > { %v425_v22 = vsub.f32 %v419_v14, %v424_v21 }
 0x231   : > { %v426_v23 = vmul.f32 1.442695, %v425_v22 }
 0x233   : > { %731 = vpow2.f32 %v426_v23 }
 0x239   : > { %v732_v24 = vpop.eup %731 }
 0x23a   : > { %v428_v25 = vsel %vm343_vm2, %v732_v24, 0.0 }
 0x23b   : > { %429 = vadd.xlane.f32.xlu0 %v428_v25 }
 0x245   : > { %368 = vrot.lane.b32.xlu2 %v311_v7, %s906_s11 }
 0x24d   : > { %446 = vrot.lane.b32.xlu2 %v311_v7, %s907_s14 }
 0x2a0   : > { %v352_v26 = vpop.xlane.xlu2 %351 }
 0x2a1   : > { %733 = vrcp.f32 %v352_v26  ;;  %v364_v32 = vand.u32 2147483648, %v352_v26  ;;  %v362_v34 = vand.u32 2147483647, %v352_v26  ;;  %vm358_vm4 = vweird.f32 %v352_v26 }
 0x2a3   : > { %v365_v37 = vor.u32 1.1754944e-38, %v364_v32  ;;  %vm363_vm6 = vcmp.eq.f32.partialorder %v362_v34, 8.507059e+37 }
 0x2a7   : > { %v734_v28 = vpop.eup %733 }
 0x2a8   : > { %v354_v29 = vmul.f32 %v734_v28, %v352_v26  ;;  %v369_v30 = vpop.permute.xlu2 %368  ;;  %vm359_vm3 = vweird.f32 %v734_v28 }
 0x2a9   : > { %389 = vmatpush.msra.mxu2 %v369_v30  ;;  %vm360_vm5 = vmor %vm358_vm4, %vm359_vm3 }
 0x2aa   : > { %v355_v31 = vsub.f32 1.0, %v354_v29 }
 0x2ac   : > { %v356_v33 = vmul.f32 %v734_v28, %v355_v31 }
 0x2ae   : > { %v430_v35 = vpop.xlane.xlu0 %429  ;;  %v357_v36 = vadd.f32 %v734_v28, %v356_v33 }
 0x2af   : > { %735 = vrcp.f32 %v430_v35  ;;  %v442_v45 = vand.u32 2147483648, %v430_v35  ;;  %v440_v47 = vand.u32 2147483647, %v430_v35  ;;  %vm436_vm8 = vweird.f32 %v430_v35 }
 0x2b0   : > { %v447_v38 = vpop.permute.xlu2 %446  ;;  %v361_v39 = vsel %vm360_vm5, %v734_v28, %v357_v36 }
 0x2b1   : > { %467 = vmatpush.msrb.mxu2 %v447_v38  ;;  %v366_v40 = vsel %vm363_vm6, %v365_v37, %v361_v39  ;;  %v443_v49 = vor.u32 1.1754944e-38, %v442_v45  ;;  %vm441_vm10 = vcmp.eq.f32.partialorder %v440_v47, 8.507059e+37 }
 0x2b2   : > { %v367_v41 = vmul.f32 %v730_v19, %v366_v40 }
 0x2b4   : > { %643 = vmatmul.msk.f32.vlgmr.msra.gmra.mxu2 %vm343_vm2, %v367_v41 }
 0x2b5   : > { %v736_v42 = vpop.eup %735 }
 0x2b6   : > { %v432_v43 = vmul.f32 %v736_v42, %v430_v35  ;;  %vm437_vm7 = vweird.f32 %v736_v42 }
 0x2b7   : > { %vm438_vm9 = vmor %vm436_vm8, %vm437_vm7 }
 0x2b8   : > { %v433_v44 = vsub.f32 1.0, %v432_v43 }
 0x2ba   : > { %v434_v46 = vmul.f32 %v736_v42, %v433_v44 }
 0x2bc   : > { %v435_v48 = vadd.f32 %v736_v42, %v434_v46 }
 0x2be   : > { %v439_v50 = vsel %vm438_vm9, %v736_v42, %v435_v48 }
 0x2bf   : > { %v444_v51 = vsel %vm441_vm10, %v443_v49, %v439_v50 }
 0x2c0   : > { %v445_v52 = vmul.f32 %v732_v24, %v444_v51 }
 0x2c2   : > { %646 = vmatmul.msk.f32.vlgmr.msrb.gmra.mxu2 %vm343_vm2, %v445_v52 }
 0x337   : > { %v391_v56 = vpop.f32.mrf.mxu2 }
 0x338   : > { %648 = vmatmul.msk.f32.vlgmr.msrb.gmra.mxu3 %vm317_vm1, %v391_v56 }
 0x345   : > { %v469_v57 = vpop.f32.mrf.mxu2 }
 0x346   : > { %647 = vmatmul.msk.f32.vlgmr.msrb.gmra.mxu1 %vm317_vm1, %v469_v57 }
 0x3bb   : > { %v515_v59 = vpop.f32.mrf.mxu3 }
 0x3c3   : > { %v492_v60 = vpop.f32.mrf.mxu1 }
 0x3c4   : > { %v516_v61 = vadd.f32 %v515_v59, %v492_v60 }
 0x3c6   : > { %v521_v62 = vadd.f32 %v728_v58, %v516_v61 }
 0x3c8   : > { %522 = vst.msk [vmem:[%s274_s13] sm:$0xff] %vm289_vm0, %v521_v62 }
 0x3c9   : > { %854 = shalt.err (!%p851_p9)
}
 0x3ca   : > { %663 = dma.vmem_to_hbm [thread:$0]  (%p1007_p4), %s537_s26, 128, %s539_s17, %s524_s25  }
 0x3cb PF: > { %s550_s22 = sand.u32 1, %s885_s18   ;;  %p1119_p10 = scmp.ge.s32.totalorder %s897_s21, 2 }
 0x3cc   : > { %s551_s28 = scalar_lea.sflag [#allocation4], %s550_s22 }
 0x3cd   : > { %p677_p13 = pnand %p1119_p10, %p1011_p6 }
 0x3cf   : > { %p678_p11 = pneg %p677_p13 }
 0x3d1   : > { %880 = dma.done.wait (%p678_p11), %s551_s28, 128  }
 0x3d2   : > { %882 = vsyncadd (%p678_p11), %s551_s28, 4294967168  ;;  %p19_p0 = scmp.ge.s32.totalorder %s981_s12, 4   ;;  %s1120_s18 = smov %s889_s19 }
 0x3d3   : > { %s1121_s19 = smov %s893_s20  ;;  %s1122_s20 = smov %s992_s15 }
 0x3d4   : > { %s1123_s21 = smov %s981_s12  ;;  %21 = sbr.rel (!%p19_p0) target bundleno = 6 (0x6), region = 93 }
 0x3d9   :  { %557 = vsyncpa [#allocation3], 1 }
 0x3da   :  { %559 = vsyncpa [#allocation3 + $0x1], 1 }
 0x3db   :  { %560 = vsyncpa [#allocation6], 1 }
 0x3dc   :  { %561 = vsyncpa [#allocation4], 1 }
 0x3dd   :  { %563 = vsyncpa [#allocation4 + $0x1], 1 }

</bundles_post_ra>
